<compile_context>
chip_gen: v5e
topology: v5e:2x2
jax: 0.10.0
libtpu: 0.0.40
codegen_flags: <defaults>
</compile_context>

<pallas_src>
import functools

import jax
import jax.numpy as jnp
from jax.experimental import pallas as pl
from jax.experimental.pallas import tpu as pltpu


# ---------------------------------------------------------------------------
# Kernel
# ---------------------------------------------------------------------------
def _embed_to_feats_kernel(x_ref, w_ref, bias_ref, g_ref, b_ref, o_ref, *,
                           eps: float, d_true: int):
    """y = x @ W_t + b followed by LayerNorm(d_true) over the last dim.

    x_ref:      (TR, E)      native dtype (bf16 goes straight to the MXU)
    w_ref:      (E, D_pad)   native dtype, pre-transposed, zero lane-padded
    bias/g/b:   (1, D_pad)
    o_ref:      (TR, D_pad)
    Columns >= d_true are zero weight/bias padding; they are masked out of the
    variance here and sliced off by the wrapper.
    """
    # Native-dtype MXU matmul (bf16 x bf16 -> f32 natively), f32 accumulation.
    y = jnp.dot(x_ref[...], w_ref[...], preferred_element_type=jnp.float32)
    y = y + bias_ref[...].astype(jnp.float32)

    d_pad = y.shape[-1]
    inv_d = 1.0 / d_true
    # Padded columns of y are exactly zero, so a plain sum over D_pad already
    # equals the sum over the true D columns.
    mean = jnp.sum(y, axis=-1, keepdims=True) * inv_d
    centered = y - mean
    if d_pad != d_true:
        col = jax.lax.broadcasted_iota(jnp.int32, y.shape, dimension=1)
        centered = jnp.where(col < d_true, centered, 0.0)
    # Two-pass (centered) variance: matches nn.LayerNorm and avoids the
    # catastrophic cancellation of the E[y^2] - mean^2 form.
    var = jnp.sum(centered * centered, axis=-1, keepdims=True) * inv_d
    inv = jax.lax.rsqrt(var + eps)

    g = g_ref[...].astype(jnp.float32)
    b = b_ref[...].astype(jnp.float32)
    o_ref[...] = (centered * inv * g + b).astype(o_ref.dtype)


# ---------------------------------------------------------------------------
# Sizing helpers
# ---------------------------------------------------------------------------
def _round_up(x: int, m: int) -> int:
    return ((x + m - 1) // m) * m


def _vmem_capacity_bytes() -> int:
    try:
        return int(pltpu.get_tpu_info().vmem_capacity_bytes)
    except Exception:
        return 64 * 1024 * 1024          # conservative default (v7x per-TC)


def _num_tensorcores() -> int:
    # TODO(synk): query per-chip TensorCore count directly when exposed; v7x
    # is currently the only generation with 2 TCs per chip.
    try:
        if "v7" in jax.devices()[0].device_kind.lower():
            return 2
    except Exception:
        pass
    return 1


def _choose_tile_rows(n_rows, e_dim, d_pad, x_itemsize, w_itemsize,
                      out_itemsize, *, num_cores, max_tile_rows=2048,
                      vmem_budget_bytes=None):
    """Largest row tile whose pipelined blocks + f32 temporaries fit VMEM."""
    if vmem_budget_bytes is None:
        # Generation-aware: ~40% of physical VMEM for the pipelined blocks,
        # leaving headroom for Mosaic internal scratch and vreg spill slack.
        vmem_budget_bytes = (2 * _vmem_capacity_bytes()) // 5

    # Blocks resident across the whole grid (weight + LN params).  Weight is
    # counted twice in case the single-buffering request is not honored.
    resident = 2 * e_dim * d_pad * w_itemsize + 6 * d_pad * 4
    avail = max(vmem_budget_bytes - resident, 0)

    # Per-row cost: double-buffered x and out blocks plus ~3 compiler-
    # materialized (TR, D_pad) f32 temporaries (y, centered, normalize chain).
    per_row = 2 * e_dim * x_itemsize + 2 * d_pad * out_itemsize + 3 * d_pad * 4

    # Sublane packing of the narrowest block dtype: 8 (f32), 16 (bf16), 32 (i8).
    pack = max(32 // min(x_itemsize, out_itemsize), 8)

    t = min(max_tile_rows, avail // max(per_row, 1))
    t = max((t // pack) * pack, pack)

    # Keep >= num_cores grid steps on multi-TensorCore chips (v7x) so the
    # "parallel" axis actually uses every core.
    if num_cores > 1 and n_rows > pack:
        t = min(t, _round_up(pl.cdiv(n_rows, num_cores), pack))

    if n_rows <= t:
        return n_rows                    # single full-extent block
    return t


# ---------------------------------------------------------------------------
# One-time parameter preparation (do this at model-load time, not per call)
# ---------------------------------------------------------------------------
def prepare_embed_to_feats_params(weight, bias, gamma, beta, *,
                                  compute_dtype=None):
    """Convert PyTorch-layout params once.

    weight: (D, spk_emb_dim) as in nn.Linear; bias/gamma/beta: (D,).
    Returns (w_t, bias_p, gamma_p, beta_p): weight transposed to
    (spk_emb_dim, D_pad) and everything zero-padded so D_pad is a multiple of
    128 (lane-dense unmasked stores).  Optionally cast the weight to
    compute_dtype (e.g. bf16) to halve weight DMA bytes.
    """
    d_dim, e_dim = weight.shape
    d_pad = _round_up(d_dim, 128)
    if compute_dtype is not None:
        weight = weight.astype(compute_dtype)
    w_t = jnp.transpose(weight)          # (E, D)
    pad = d_pad - d_dim
    if pad:
        w_t = jnp.pad(w_t, ((0, 0), (0, pad)))
        bias = jnp.pad(bias, (0, pad))
        gamma = jnp.pad(gamma, (0, pad))
        beta = jnp.pad(beta, (0, pad))
    return (w_t, bias.reshape(1, d_pad), gamma.reshape(1, d_pad),
            beta.reshape(1, d_pad))


# ---------------------------------------------------------------------------
# Forward wrapper
# ---------------------------------------------------------------------------
def embed_to_feats(x, w_t, bias_p, gamma_p, beta_p, *, emb_dim, n_freqs,
                   eps: float = 1e-5, tile_rows: int | None = None):
    """Forward of Embed_to_Feats on prepared params.

    x: (B, T, spk_emb_dim)  ->  (B, emb_dim, T, n_freqs)
    """
    B, T, E = x.shape
    D = emb_dim * n_freqs
    e_w, d_pad = w_t.shape
    assert e_w == E, (e_w, E)
    assert d_pad % 128 == 0 and d_pad >= D, (d_pad, D)
    N = B * T

    x2 = x.reshape(N, E)

    if tile_rows is None:
        tile_rows = _choose_tile_rows(
            N, E, d_pad, x.dtype.itemsize, w_t.dtype.itemsize,
            x.dtype.itemsize, num_cores=_num_tensorcores())
    grid = (pl.cdiv(N, tile_rows),)      # ragged last tile: Pallas clips DMAs

    kernel = functools.partial(_embed_to_feats_kernel, eps=eps, d_true=D)
    cost = pl.CostEstimate(
        flops=2 * N * E * d_pad + 8 * N * d_pad,
        transcendentals=N,
        bytes_accessed=(N * E * x.dtype.itemsize
                        + E * d_pad * w_t.dtype.itemsize
                        + 3 * d_pad * bias_p.dtype.itemsize
                        + N * d_pad * x.dtype.itemsize))
    vmem_limit = min(int(0.8 * _vmem_capacity_bytes()), 128 * 1024 * 1024)

    def build(single_buffer_consts: bool):
        const_kw = ({"pipeline_mode": pl.Buffered(1)}
                    if single_buffer_consts else {})
        const_map = lambda i: (0, 0)
        return pl.pallas_call(
            kernel,
            out_shape=jax.ShapeDtypeStruct((N, d_pad), x.dtype),
            grid_spec=pltpu.PrefetchScalarGridSpec(
                num_scalar_prefetch=0,
                grid=grid,
                in_specs=[
                    pl.BlockSpec((tile_rows, E), lambda i: (i, 0)),
                    pl.BlockSpec((E, d_pad), const_map, **const_kw),   # W^T
                    pl.BlockSpec((1, d_pad), const_map, **const_kw),   # bias
                    pl.BlockSpec((1, d_pad), const_map, **const_kw),   # gamma
                    pl.BlockSpec((1, d_pad), const_map, **const_kw),   # beta
                ],
                out_specs=pl.BlockSpec((tile_rows, d_pad), lambda i: (i, 0)),
            ),
            compiler_params=pltpu.CompilerParams(
                dimension_semantics=("parallel",),   # shards rows across TCs
                vmem_limit_bytes=vmem_limit,
            ),
            cost_estimate=cost,
        )

    try:
        out2 = build(True)(x2, w_t, bias_p, gamma_p, beta_p)
    except Exception:
        # Fallback if this JAX/Mosaic build rejects single-buffered constant
        # blocks (pl.Buffered(1)): default double-buffered specs.
        out2 = build(False)(x2, w_t, bias_p, gamma_p, beta_p)

    if d_pad != D:
        out2 = out2[:, :D]
    # TODO(synk): downstream consumers could fuse this layout change instead
    # of materializing (B, emb_dim, T, n_freqs).
    if T == 1:
        return out2.reshape(B, emb_dim, T, n_freqs)   # permute is a no-op
    return out2.reshape(B, T, emb_dim, n_freqs).transpose(0, 2, 1, 3)


# ---------------------------------------------------------------------------
# Pure-JAX reference (PyTorch-layout params)
# ---------------------------------------------------------------------------
def _reference(x, weight, bias, gamma, beta, *, emb_dim, n_freqs, eps=1e-5):
    B, T, E = x.shape
    x2 = x.reshape(B * T, E).astype(jnp.float32)
    y = jnp.dot(x2, weight.astype(jnp.float32).T) + bias.astype(jnp.float32)
    mean = jnp.mean(y, axis=-1, keepdims=True)
    var = jnp.mean((y - mean) ** 2, axis=-1, keepdims=True)
    yn = (y - mean) * jax.lax.rsqrt(var + eps)
    yn = yn * gamma.astype(jnp.float32) + beta.astype(jnp.float32)
    return (yn.astype(x.dtype)
            .reshape(B, T, emb_dim, n_freqs).transpose(0, 2, 1, 3))


if __name__ == "__main__":
    key = jax.random.PRNGKey(0)
    keys = jax.random.split(key, 10)

    def make_case(kx, kw, kb, kg, kbeta, B, T, spk_emb_dim, emb_dim, n_freqs):
        D = emb_dim * n_freqs
        # Values exactly representable in bf16 so the comparison is robust to
        # the MXU precision path.
        x = jax.random.randint(kx, (B, T, spk_emb_dim), -4, 5).astype(jnp.float32)
        weight = (jax.random.randint(kw, (D, spk_emb_dim), -4, 5)
                  .astype(jnp.float32) / 8.0)           # PyTorch (out, in)
        bias = jax.random.randint(kb, (D,), -4, 5).astype(jnp.float32) / 8.0
        gamma = jnp.ones((D,), jnp.float32) + 0.1 * jax.random.normal(
            kg, (D,), dtype=jnp.float32)
        beta = 0.1 * jax.random.normal(kbeta, (D,), dtype=jnp.float32)
        return x, weight, bias, gamma, beta

    # Case 1: [B, T, E] embeddings, D = 128 (lane-aligned, no padding).
    # Case 2: realtime [B, 1, E] embeddings, D = 80 (exercises lane padding,
    #         masked variance, and the T == 1 reshape-only output path).
    cases = [
        ((2, 8, 32, 8, 16), keys[0:5]),
        ((2, 1, 32, 4, 20), keys[5:10]),
    ]
    for (B, T, spk_emb_dim, emb_dim, n_freqs), ks in cases:
        x, weight, bias, gamma, beta = make_case(*ks, B, T, spk_emb_dim,
                                                 emb_dim, n_freqs)
        params = prepare_embed_to_feats_params(weight, bias, gamma, beta)
        out = embed_to_feats(x, *params, emb_dim=emb_dim, n_freqs=n_freqs,
                             eps=1e-5)
        out = jax.block_until_ready(out)

        ref = _reference(x, weight, bias, gamma, beta,
                         emb_dim=emb_dim, n_freqs=n_freqs, eps=1e-5)
        assert out.shape == (B, emb_dim, T, n_freqs), out.shape
        assert out.dtype == x.dtype
        assert jnp.allclose(out, ref, atol=1e-4, rtol=1e-4), \
            float(jnp.max(jnp.abs(out - ref)))

    print("KERNEL_OK")
</pallas_src>

<mosaic_0001>
module attributes {stable_mosaic.version = 11 : i64} {
  func.func @_embed_to_feats_kernel(%arg0: i32, %arg1: memref<16x32xf32, #tpu.memory_space<vmem>>, %arg2: memref<32x128xf32, #tpu.memory_space<vmem>>, %arg3: memref<1x128xf32, #tpu.memory_space<vmem>>, %arg4: memref<1x128xf32, #tpu.memory_space<vmem>>, %arg5: memref<1x128xf32, #tpu.memory_space<vmem>>, %arg6: memref<16x128xf32, #tpu.memory_space<vmem>>) attributes {dimension_semantics = [#tpu.dimension_semantics<parallel>], iteration_bounds = array<i64: 1>, scalar_prefetch = 0 : i64, scratch_operands = 0 : i64, tpu.core_type = #tpu.core_type<tc>, window_params = [{transform_indices = @transform_0, window_bounds = array<i64: 16, 32>}, {pipeline_mode = #tpu.pipeline_mode<synchronous>, transform_indices = @transform_1, window_bounds = array<i64: 32, 128>}, {pipeline_mode = #tpu.pipeline_mode<synchronous>, transform_indices = @transform_2, window_bounds = array<i64: 1, 128>}, {pipeline_mode = #tpu.pipeline_mode<synchronous>, transform_indices = @transform_3, window_bounds = array<i64: 1, 128>}, {pipeline_mode = #tpu.pipeline_mode<synchronous>, transform_indices = @transform_4, window_bounds = array<i64: 1, 128>}, {transform_indices = @transform_5, window_bounds = array<i64: 16, 128>}]} {
    %c0 = arith.constant 0 : index
    %c0_0 = arith.constant 0 : index
    %0 = vector.load %arg1[%c0, %c0_0] : memref<16x32xf32, #tpu.memory_space<vmem>>, vector<16x32xf32>
    %c0_1 = arith.constant 0 : index
    %c0_2 = arith.constant 0 : index
    %1 = vector.load %arg2[%c0_1, %c0_2] : memref<32x128xf32, #tpu.memory_space<vmem>>, vector<32x128xf32>
    %cst = arith.constant dense<0.000000e+00> : vector<16x128xf32>
    %2 = tpu.matmul %0, %1, %cst {dimension_numbers = #tpu.dot_dimension_numbers<[1], [0], [0], [1], [0, 0, 1, 1], [], []>} : vector<16x32xf32>, vector<32x128xf32>, vector<16x128xf32> -> vector<16x128xf32>
    %c0_3 = arith.constant 0 : index
    %c0_4 = arith.constant 0 : index
    %3 = vector.load %arg3[%c0_3, %c0_4] : memref<1x128xf32, #tpu.memory_space<vmem>>, vector<1x128xf32>
    %4 = vector.broadcast %3 : vector<1x128xf32> to vector<16x128xf32>
    %5 = arith.addf %2, %4 : vector<16x128xf32>
    %cst_5 = arith.constant dense<0.000000e+00> : vector<16xf32>
    %6 = vector.multi_reduction <add>, %5, %cst_5 [1] : vector<16x128xf32> to vector<16xf32>
    %7 = vector.shape_cast %6 : vector<16xf32> to vector<16x1xf32>
    %cst_6 = arith.constant 7.812500e-03 : f32
    %8 = vector.broadcast %cst_6 : f32 to vector<16x1xf32>
    %9 = arith.mulf %7, %8 : vector<16x1xf32>
    %10 = vector.broadcast %9 : vector<16x1xf32> to vector<16x128xf32>
    %11 = arith.subf %5, %10 : vector<16x128xf32>
    %12 = arith.mulf %11, %11 : vector<16x128xf32>
    %cst_7 = arith.constant dense<0.000000e+00> : vector<16xf32>
    %13 = vector.multi_reduction <add>, %12, %cst_7 [1] : vector<16x128xf32> to vector<16xf32>
    %14 = vector.shape_cast %13 : vector<16xf32> to vector<16x1xf32>
    %cst_8 = arith.constant 7.812500e-03 : f32
    %15 = vector.broadcast %cst_8 : f32 to vector<16x1xf32>
    %16 = arith.mulf %14, %15 : vector<16x1xf32>
    %cst_9 = arith.constant 9.99999974E-6 : f32
    %17 = vector.broadcast %cst_9 : f32 to vector<16x1xf32>
    %18 = arith.addf %16, %17 : vector<16x1xf32>
    %19 = math.rsqrt %18 : vector<16x1xf32>
    %c0_10 = arith.constant 0 : index
    %c0_11 = arith.constant 0 : index
    %20 = vector.load %arg4[%c0_10, %c0_11] : memref<1x128xf32, #tpu.memory_space<vmem>>, vector<1x128xf32>
    %c0_12 = arith.constant 0 : index
    %c0_13 = arith.constant 0 : index
    %21 = vector.load %arg5[%c0_12, %c0_13] : memref<1x128xf32, #tpu.memory_space<vmem>>, vector<1x128xf32>
    %22 = vector.broadcast %19 : vector<16x1xf32> to vector<16x128xf32>
    %23 = arith.mulf %11, %22 : vector<16x128xf32>
    %24 = vector.broadcast %20 : vector<1x128xf32> to vector<16x128xf32>
    %25 = arith.mulf %23, %24 : vector<16x128xf32>
    %26 = vector.broadcast %21 : vector<1x128xf32> to vector<16x128xf32>
    %27 = arith.addf %25, %26 : vector<16x128xf32>
    %c0_14 = arith.constant 0 : index
    %c0_15 = arith.constant 0 : index
    %28 = vector.load %arg6[%c0_14, %c0_15] : memref<16x128xf32, #tpu.memory_space<vmem>>, vector<16x128xf32>
    tpu.vector_store %arg6[%c0_14, %c0_15], %27 {strides = array<i32>} : memref<16x128xf32, #tpu.memory_space<vmem>>, vector<16x128xf32>,
    return
  }
  func.func @transform_0(%arg0: i32) -> (i32, i32) {
    %c0_i32 = arith.constant 0 : i32
    %c0_i32_0 = arith.constant 0 : i32
    return %arg0, %c0_i32 : i32, i32
  }
  func.func @transform_1(%arg0: i32) -> (i32, i32) {
    %c0_i32 = arith.constant 0 : i32
    %c0_i32_0 = arith.constant 0 : i32
    %c0_i32_1 = arith.constant 0 : i32
    return %c0_i32, %c0_i32_0 : i32, i32
  }
  func.func @transform_2(%arg0: i32) -> (i32, i32) {
    %c0_i32 = arith.constant 0 : i32
    %c0_i32_0 = arith.constant 0 : i32
    %c0_i32_1 = arith.constant 0 : i32
    return %c0_i32, %c0_i32_0 : i32, i32
  }
  func.func @transform_3(%arg0: i32) -> (i32, i32) {
    %c0_i32 = arith.constant 0 : i32
    %c0_i32_0 = arith.constant 0 : i32
    %c0_i32_1 = arith.constant 0 : i32
    return %c0_i32, %c0_i32_0 : i32, i32
  }
  func.func @transform_4(%arg0: i32) -> (i32, i32) {
    %c0_i32 = arith.constant 0 : i32
    %c0_i32_0 = arith.constant 0 : i32
    %c0_i32_1 = arith.constant 0 : i32
    return %c0_i32, %c0_i32_0 : i32, i32
  }
  func.func @transform_5(%arg0: i32) -> (i32, i32) {
    %c0_i32 = arith.constant 0 : i32
    %c0_i32_0 = arith.constant 0 : i32
    return %arg0, %c0_i32 : i32, i32
  }
}

module attributes {stable_mosaic.version = 11 : i64} {
  func.func @_embed_to_feats_kernel(%arg0: i32, %arg1: memref<16x32xf32, #tpu.memory_space<vmem>>, %arg2: memref<32x128xf32, #tpu.memory_space<vmem>>, %arg3: memref<1x128xf32, #tpu.memory_space<vmem>>, %arg4: memref<1x128xf32, #tpu.memory_space<vmem>>, %arg5: memref<1x128xf32, #tpu.memory_space<vmem>>, %arg6: memref<16x128xf32, #tpu.memory_space<vmem>>) attributes {dimension_semantics = [#tpu.dimension_semantics<parallel>], iteration_bounds = array<i64: 1>, scalar_prefetch = 0 : i64, scratch_operands = 0 : i64, tpu.core_type = #tpu.core_type<tc>, window_params = [{transform_indices = @transform_0, window_bounds = array<i64: 16, 32>}, {pipeline_mode = #tpu.pipeline_mode<synchronous>, transform_indices = @transform_1, window_bounds = array<i64: 32, 128>}, {pipeline_mode = #tpu.pipeline_mode<synchronous>, transform_indices = @transform_2, window_bounds = array<i64: 1, 128>}, {pipeline_mode = #tpu.pipeline_mode<synchronous>, transform_indices = @transform_3, window_bounds = array<i64: 1, 128>}, {pipeline_mode = #tpu.pipeline_mode<synchronous>, transform_indices = @transform_4, window_bounds = array<i64: 1, 128>}, {transform_indices = @transform_5, window_bounds = array<i64: 16, 128>}]} {
    %c0 = arith.constant 0 : index
    %c0_0 = arith.constant 0 : index
    %0 = vector.load %arg1[%c0, %c0_0] : memref<16x32xf32, #tpu.memory_space<vmem>>, vector<16x32xf32>
    %c0_1 = arith.constant 0 : index
    %c0_2 = arith.constant 0 : index
    %1 = vector.load %arg2[%c0_1, %c0_2] : memref<32x128xf32, #tpu.memory_space<vmem>>, vector<32x128xf32>
    %cst = arith.constant dense<0.000000e+00> : vector<16x128xf32>
    %2 = tpu.matmul %0, %1, %cst {dimension_numbers = #tpu.dot_dimension_numbers<[1], [0], [0], [1], [0, 0, 1, 1], [], []>} : vector<16x32xf32>, vector<32x128xf32>, vector<16x128xf32> -> vector<16x128xf32>
    %c0_3 = arith.constant 0 : index
    %c0_4 = arith.constant 0 : index
    %3 = vector.load %arg3[%c0_3, %c0_4] : memref<1x128xf32, #tpu.memory_space<vmem>>, vector<1x128xf32>
    %4 = vector.broadcast %3 : vector<1x128xf32> to vector<16x128xf32>
    %5 = arith.addf %2, %4 : vector<16x128xf32>
    %cst_5 = arith.constant dense<0.000000e+00> : vector<16xf32>
    %6 = vector.multi_reduction <add>, %5, %cst_5 [1] : vector<16x128xf32> to vector<16xf32>
    %7 = vector.shape_cast %6 : vector<16xf32> to vector<16x1xf32>
    %cst_6 = arith.constant 7.812500e-03 : f32
    %8 = vector.broadcast %cst_6 : f32 to vector<16x1xf32>
    %9 = arith.mulf %7, %8 : vector<16x1xf32>
    %10 = vector.broadcast %9 : vector<16x1xf32> to vector<16x128xf32>
    %11 = arith.subf %5, %10 : vector<16x128xf32>
    %12 = arith.mulf %11, %11 : vector<16x128xf32>
    %cst_7 = arith.constant dense<0.000000e+00> : vector<16xf32>
    %13 = vector.multi_reduction <add>, %12, %cst_7 [1] : vector<16x128xf32> to vector<16xf32>
    %14 = vector.shape_cast %13 : vector<16xf32> to vector<16x1xf32>
    %cst_8 = arith.constant 7.812500e-03 : f32
    %15 = vector.broadcast %cst_8 : f32 to vector<16x1xf32>
    %16 = arith.mulf %14, %15 : vector<16x1xf32>
    %cst_9 = arith.constant 9.99999974E-6 : f32
    %17 = vector.broadcast %cst_9 : f32 to vector<16x1xf32>
    %18 = arith.addf %16, %17 : vector<16x1xf32>
    %19 = math.rsqrt %18 : vector<16x1xf32>
    %c0_10 = arith.constant 0 : index
    %c0_11 = arith.constant 0 : index
    %20 = vector.load %arg4[%c0_10, %c0_11] : memref<1x128xf32, #tpu.memory_space<vmem>>, vector<1x128xf32>
    %c0_12 = arith.constant 0 : index
    %c0_13 = arith.constant 0 : index
    %21 = vector.load %arg5[%c0_12, %c0_13] : memref<1x128xf32, #tpu.memory_space<vmem>>, vector<1x128xf32>
    %22 = vector.broadcast %19 : vector<16x1xf32> to vector<16x128xf32>
    %23 = arith.mulf %11, %22 : vector<16x128xf32>
    %24 = vector.broadcast %20 : vector<1x128xf32> to vector<16x128xf32>
    %25 = arith.mulf %23, %24 : vector<16x128xf32>
    %26 = vector.broadcast %21 : vector<1x128xf32> to vector<16x128xf32>
    %27 = arith.addf %25, %26 : vector<16x128xf32>
    %c0_14 = arith.constant 0 : index
    %c0_15 = arith.constant 0 : index
    %28 = vector.load %arg6[%c0_14, %c0_15] : memref<16x128xf32, #tpu.memory_space<vmem>>, vector<16x128xf32>
    tpu.vector_store %arg6[%c0_14, %c0_15], %27 {strides = array<i32>} : memref<16x128xf32, #tpu.memory_space<vmem>>, vector<16x128xf32>,
    return
  }
  func.func @transform_0(%arg0: i32) -> (i32, i32) {
    %c0_i32 = arith.constant 0 : i32
    %c0_i32_0 = arith.constant 0 : i32
    return %arg0, %c0_i32 : i32, i32
  }
  func.func @transform_1(%arg0: i32) -> (i32, i32) {
    %c0_i32 = arith.constant 0 : i32
    %c0_i32_0 = arith.constant 0 : i32
    %c0_i32_1 = arith.constant 0 : i32
    return %c0_i32, %c0_i32_0 : i32, i32
  }
  func.func @transform_2(%arg0: i32) -> (i32, i32) {
    %c0_i32 = arith.constant 0 : i32
    %c0_i32_0 = arith.constant 0 : i32
    %c0_i32_1 = arith.constant 0 : i32
    return %c0_i32, %c0_i32_0 : i32, i32
  }
  func.func @transform_3(%arg0: i32) -> (i32, i32) {
    %c0_i32 = arith.constant 0 : i32
    %c0_i32_0 = arith.constant 0 : i32
    %c0_i32_1 = arith.constant 0 : i32
    return %c0_i32, %c0_i32_0 : i32, i32
  }
  func.func @transform_4(%arg0: i32) -> (i32, i32) {
    %c0_i32 = arith.constant 0 : i32
    %c0_i32_0 = arith.constant 0 : i32
    %c0_i32_1 = arith.constant 0 : i32
    return %c0_i32, %c0_i32_0 : i32, i32
  }
  func.func @transform_5(%arg0: i32) -> (i32, i32) {
    %c0_i32 = arith.constant 0 : i32
    %c0_i32_0 = arith.constant 0 : i32
    return %arg0, %c0_i32 : i32, i32
  }
}

</mosaic_0001>

<bundles_post_ra>
// kernel: tpu_custom_call.1
= control target key start
LH: loop header
LB: loop body
LE: loop exit
PB: predicated region body
PF: predicated region fallthrough
CT: control target
= control target key end

     0   :  { %10 = vsyncpa [#allocation3], 0  ;;  %s325_s0 = inlined_call_operand.hbm [shape: f32[16,32], index: 0, kind: input, shape index: {}]   ;;  %s326_s1 = inlined_call_operand.hbm [shape: f32[32,128], index: 1, kind: input, shape index: {}]   ;;  %s327_s2 = inlined_call_operand.vmem [shape: f32[1,128], index: 2, kind: input, shape index: {}]   ;;  %s328_s3 = inlined_call_operand.vmem [shape: f32[1,128], index: 3, kind: input, shape index: {}]   ;;  %s329_s4 = inlined_call_operand.vmem [shape: f32[1,128], index: 4, kind: input, shape index: {}]   ;;  %s330_s5 = inlined_call_operand.hbm [shape: f32[16,128], index: 5, kind: output, shape index: {}]  }
   0x1   :  { %11 = vsyncpa [#allocation6], 0 }
   0x2   :  { %12 = vsyncpa [#allocation4], 0  ;;  %s17_s20 = sshll.u32 %s325_s0, 4  ;;  %s263_s21 = smov [#allocation2]   ;;  %s18_s20 = int_to_ptr.hbm [resolvable:$true] %s17_s20 }
   0x3   :  { %s19_s22 = sshll.u32 %s263_s21, 4  ;;  %s30_s25 = sshll.u32 %s326_s1, 4  ;;  %s20_s22 = int_to_ptr.vmem [resolvable:$true] %s19_s22  ;;  %s31_s25 = int_to_ptr.hbm [resolvable:$true] %s30_s25 }
   0x4   :  { %s264_s26 = smov 128   ;;  %s265_s27 = smov 8  }
   0x5   :  { %25 = dma.hbm_to_vmem [thread:$0]  %s18_s20, 256, %s20_s22, [#allocation3], %s264_s26, %s264_s26, %s265_s27  }
   0x6   :  { %s266_s28 = smov [#allocation5]  }
   0x7   :  { %s32_s29 = sshll.u32 %s266_s28, 4  ;;  %s33_s29 = int_to_ptr.vmem [resolvable:$true] %s32_s29 }
   0x8   :  { %38 = dma.hbm_to_vmem [thread:$0]  %s31_s25, 512, %s33_s29, [#allocation6], %s264_s26, %s264_s26, %s265_s27  }
   0x9   :  { %257 = dma.done.wait [#allocation3], 256  }
   0xa   :  { %258 = vsyncadd [#allocation3], 4294967040 }
   0xb   :  { %259 = dma.done.wait [#allocation6], 512  }
   0xc   :  { %260 = vsyncadd [#allocation6], 4294966784  ;;  %v58_v0 = vld [vmem:[#allocation5 + $0x18] sm:$0xff]  ;;  %v57_v1 = vld [vmem:[#allocation5 + $0x10] sm:$0xff]  ;;  %vm63_vm0 = vcmask 261120   ;;  %s267_s8 = smov [#allocation7]  }
   0xd   :  { %82 = vmatpush.msra.mxu0 %v58_v0  ;;  %169 = vmatpush.msra.mxu1 %v58_v0  ;;  %v56_v2 = vld [vmem:[#allocation5 + $0x8] sm:$0xff]  ;;  %v55_v3 = vld [vmem:[#allocation5] sm:$0xff]  ;;  %v53_v4 = vld [vmem:[#allocation2] sm:$0xff]  ;;  %s153_s11 = sshll.u32 %s330_s5, 4  ;;  %s154_s11 = int_to_ptr.hbm [resolvable:$true] %s153_s11 }
   0xe   :  { %v54_v5 = vld [vmem:[#allocation2 + $0x8] sm:$0xff]  ;;  %v178_v6 = vld [vmem:[%s327_s2] ss:$0 sm:$0xff] }
   0xf   :  { %83 = vmatpush.msra.mxu0 %v57_v1  ;;  %170 = vmatpush.msra.mxu1 %v57_v1  ;;  %v179_v33 = vld [vmem:[%s328_s3] ss:$0 sm:$0xff]  ;;  %s151_s3 = sshll.u32 %s267_s8, 4  ;;  %s152_s3 = int_to_ptr.vmem [resolvable:$true] %s151_s3 }
  0x10   :  { %v180_v37 = vld [vmem:[%s329_s4] ss:$0 sm:$0xff] }
  0x11   :  { %84 = vmatpush.msra.mxu0 %v56_v2  ;;  %171 = vmatpush.msra.mxu1 %v56_v2 }
  0x13   :  { %85 = vmatpush.msra.mxu0 %v55_v3  ;;  %172 = vmatpush.msra.mxu1 %v55_v3 }
  0x14   :  { %167 = vmatmul.msk.f32.vlgmr.msra.gmra.mxu0 %vm63_vm0, %v53_v4  ;;  %168 = vmatmul.msk.f32.vlgmr.msra.gmra.mxu1 %vm63_vm0, %v54_v5 }
  0x91   :  { %v87_v7 = vpop.f32.mrf.mxu0  ;;  %v90_v9 = vpop.f32.mrf.mxu1 }
  0x92   :  { %v88_v8 = vadd.f32 %v178_v6, %v87_v7  ;;  %v91_v10 = vadd.f32 %v178_v6, %v90_v9 }
  0x94   :  { %93 = vadd.xlane.f32.xlu0 %v88_v8 }
  0x9c   :  { %95 = vadd.xlane.f32.xlu0 %v91_v10 }
 0x107   :  { %v94_v11 = vpop.xlane.xlu0 %93 }
 0x108   :  { %v97_v12 = vmul.f32 0.0078125, %v94_v11 }
 0x10a   :  { %v99_v13 = vsub.f32 %v88_v8, %v97_v12 }
 0x10c   :  { %v101_v14 = vmul.f32 %v99_v13, %v99_v13 }
 0x10e   :  { %103 = vadd.xlane.f32.xlu1 %v101_v14 }
 0x10f   :  { %v96_v15 = vpop.xlane.xlu0 %95 }
 0x110   :  { %v98_v16 = vmul.f32 0.0078125, %v96_v15 }
 0x112   :  { %v100_v17 = vsub.f32 %v91_v10, %v98_v16 }
 0x114   :  { %v102_v18 = vmul.f32 %v100_v17, %v100_v17 }
 0x116   :  { %105 = vadd.xlane.f32.xlu1 %v102_v18 }
 0x181   :  { %v104_v19 = vpop.xlane.xlu1 %103 }
 0x182   :  { %v107_v20 = vmul.f32 0.0078125, %v104_v19 }
 0x184   :  { %v109_v21 = vadd.f32 1e-05, %v107_v20 }
 0x186   :  { %181 = vrsqrt.f32 %v109_v21  ;;  %vm117_vm2 = vweird.f32 %v109_v21 }
 0x189   :  { %v106_v22 = vpop.xlane.xlu1 %105 }
 0x18a   :  { %v108_v23 = vmul.f32 0.0078125, %v106_v22 }
 0x18c   :  { %v182_v24 = vpop.eup %181  ;;  %v110_v25 = vadd.f32 1e-05, %v108_v23 }
 0x18d   :  { %v112_v26 = vmul.f32 %v182_v24, %v109_v21  ;;  %vm118_vm1 = vweird.f32 %v182_v24 }
 0x18e   :  { %183 = vrsqrt.f32 %v110_v25  ;;  %vm119_vm3 = vmor %vm117_vm2, %vm118_vm1  ;;  %vm127_vm5 = vweird.f32 %v110_v25 }
 0x18f   :  { %v113_v27 = vmul.f32 %v182_v24, %v112_v26 }
 0x191   :  { %v114_v28 = vmul.f32 0.5, %v113_v27 }
 0x193   :  { %v115_v29 = vsub.f32 1.5, %v114_v28 }
 0x194   :  { %v184_v30 = vpop.eup %183 }
 0x195   :  { %v116_v31 = vmul.f32 %v182_v24, %v115_v29  ;;  %v122_v32 = vmul.f32 %v184_v30, %v110_v25  ;;  %vm128_vm4 = vweird.f32 %v184_v30 }
 0x196   :  { %vm129_vm6 = vmor %vm127_vm5, %vm128_vm4 }
 0x197   :  { %v120_v34 = vsel %vm119_vm3, %v182_v24, %v116_v31  ;;  %v123_v35 = vmul.f32 %v184_v30, %v122_v32 }
 0x198   :  { %v133_v36 = vmul.f32 %v120_v34, %v99_v13 }
 0x199   :  { %v124_v38 = vmul.f32 0.5, %v123_v35 }
 0x19a   :  { %v138_v39 = vmul.f32 %v179_v33, %v133_v36 }
 0x19b   :  { %v125_v40 = vsub.f32 1.5, %v124_v38 }
 0x19c   :  { %v143_v41 = vadd.f32 %v180_v37, %v138_v39 }
 0x19d   :  { %v126_v42 = vmul.f32 %v184_v30, %v125_v40 }
 0x19e   :  { %145 = vst [vmem:[#allocation7] sm:$0xff] %v143_v41 }
 0x19f   :  { %v130_v43 = vsel %vm129_vm6, %v184_v30, %v126_v42 }
 0x1a0   :  { %v134_v44 = vmul.f32 %v130_v43, %v100_v17 }
 0x1a2   :  { %v139_v45 = vmul.f32 %v179_v33, %v134_v44 }
 0x1a4   :  { %v144_v46 = vadd.f32 %v180_v37, %v139_v45 }
 0x1a6   :  { %146 = vst [vmem:[#allocation7 + $0x8] sm:$0xff] %v144_v46 }
 0x1a7   :  { %159 = dma.vmem_to_hbm [thread:$0]  %s152_s3, 256, %s154_s11, [#allocation4], %s264_s26, %s264_s26, %s265_s27  }
 0x1a8   :  { %261 = dma.done.wait [#allocation4], 256  }
 0x1a9   :  { %262 = vsyncadd [#allocation4], 4294967040 }
 0x1aa   :  { %164 = vsyncpa [#allocation3], 1 }
 0x1ab   :  { %165 = vsyncpa [#allocation6], 1 }
 0x1ac   :  { %166 = vsyncpa [#allocation4], 1 }

// kernel: tpu_custom_call.1
= control target key start
LH: loop header
LB: loop body
LE: loop exit
PB: predicated region body
PF: predicated region fallthrough
CT: control target
= control target key end

     0   :  { %10 = vsyncpa [#allocation3], 0  ;;  %s325_s0 = inlined_call_operand.hbm [shape: f32[16,32], index: 0, kind: input, shape index: {}]   ;;  %s326_s1 = inlined_call_operand.hbm [shape: f32[32,128], index: 1, kind: input, shape index: {}]   ;;  %s327_s2 = inlined_call_operand.vmem [shape: f32[1,128], index: 2, kind: input, shape index: {}]   ;;  %s328_s3 = inlined_call_operand.vmem [shape: f32[1,128], index: 3, kind: input, shape index: {}]   ;;  %s329_s4 = inlined_call_operand.vmem [shape: f32[1,128], index: 4, kind: input, shape index: {}]   ;;  %s330_s5 = inlined_call_operand.hbm [shape: f32[16,128], index: 5, kind: output, shape index: {}]  }
   0x1   :  { %11 = vsyncpa [#allocation6], 0 }
   0x2   :  { %12 = vsyncpa [#allocation4], 0  ;;  %s17_s20 = sshll.u32 %s325_s0, 4  ;;  %s263_s21 = smov [#allocation2]   ;;  %s18_s20 = int_to_ptr.hbm [resolvable:$true] %s17_s20 }
   0x3   :  { %s19_s22 = sshll.u32 %s263_s21, 4  ;;  %s30_s25 = sshll.u32 %s326_s1, 4  ;;  %s20_s22 = int_to_ptr.vmem [resolvable:$true] %s19_s22  ;;  %s31_s25 = int_to_ptr.hbm [resolvable:$true] %s30_s25 }
   0x4   :  { %s264_s26 = smov 128   ;;  %s265_s27 = smov 8  }
   0x5   :  { %25 = dma.hbm_to_vmem [thread:$0]  %s18_s20, 256, %s20_s22, [#allocation3], %s264_s26, %s264_s26, %s265_s27  }
   0x6   :  { %s266_s28 = smov [#allocation5]  }
   0x7   :  { %s32_s29 = sshll.u32 %s266_s28, 4  ;;  %s33_s29 = int_to_ptr.vmem [resolvable:$true] %s32_s29 }
   0x8   :  { %38 = dma.hbm_to_vmem [thread:$0]  %s31_s25, 512, %s33_s29, [#allocation6], %s264_s26, %s264_s26, %s265_s27  }
   0x9   :  { %257 = dma.done.wait [#allocation3], 256  }
   0xa   :  { %258 = vsyncadd [#allocation3], 4294967040 }
   0xb   :  { %259 = dma.done.wait [#allocation6], 512  }
   0xc   :  { %260 = vsyncadd [#allocation6], 4294966784  ;;  %v58_v0 = vld [vmem:[#allocation5 + $0x18] sm:$0xff]  ;;  %v57_v1 = vld [vmem:[#allocation5 + $0x10] sm:$0xff]  ;;  %vm63_vm0 = vcmask 261120   ;;  %s267_s8 = smov [#allocation7]  }
   0xd   :  { %82 = vmatpush.msra.mxu0 %v58_v0  ;;  %169 = vmatpush.msra.mxu1 %v58_v0  ;;  %v56_v2 = vld [vmem:[#allocation5 + $0x8] sm:$0xff]  ;;  %v55_v3 = vld [vmem:[#allocation5] sm:$0xff]  ;;  %v53_v4 = vld [vmem:[#allocation2] sm:$0xff]  ;;  %s153_s11 = sshll.u32 %s330_s5, 4  ;;  %s154_s11 = int_to_ptr.hbm [resolvable:$true] %s153_s11 }
   0xe   :  { %v54_v5 = vld [vmem:[#allocation2 + $0x8] sm:$0xff]  ;;  %v178_v6 = vld [vmem:[%s327_s2] ss:$0 sm:$0xff] }
   0xf   :  { %83 = vmatpush.msra.mxu0 %v57_v1  ;;  %170 = vmatpush.msra.mxu1 %v57_v1  ;;  %v179_v33 = vld [vmem:[%s328_s3] ss:$0 sm:$0xff]  ;;  %s151_s3 = sshll.u32 %s267_s8, 4  ;;  %s152_s3 = int_to_ptr.vmem [resolvable:$true] %s151_s3 }
  0x10   :  { %v180_v37 = vld [vmem:[%s329_s4] ss:$0 sm:$0xff] }
  0x11   :  { %84 = vmatpush.msra.mxu0 %v56_v2  ;;  %171 = vmatpush.msra.mxu1 %v56_v2 }
  0x13   :  { %85 = vmatpush.msra.mxu0 %v55_v3  ;;  %172 = vmatpush.msra.mxu1 %v55_v3 }
  0x14   :  { %167 = vmatmul.msk.f32.vlgmr.msra.gmra.mxu0 %vm63_vm0, %v53_v4  ;;  %168 = vmatmul.msk.f32.vlgmr.msra.gmra.mxu1 %vm63_vm0, %v54_v5 }
  0x91   :  { %v87_v7 = vpop.f32.mrf.mxu0  ;;  %v90_v9 = vpop.f32.mrf.mxu1 }
  0x92   :  { %v88_v8 = vadd.f32 %v178_v6, %v87_v7  ;;  %v91_v10 = vadd.f32 %v178_v6, %v90_v9 }
  0x94   :  { %93 = vadd.xlane.f32.xlu0 %v88_v8 }
  0x9c   :  { %95 = vadd.xlane.f32.xlu0 %v91_v10 }
 0x107   :  { %v94_v11 = vpop.xlane.xlu0 %93 }
 0x108   :  { %v97_v12 = vmul.f32 0.0078125, %v94_v11 }
 0x10a   :  { %v99_v13 = vsub.f32 %v88_v8, %v97_v12 }
 0x10c   :  { %v101_v14 = vmul.f32 %v99_v13, %v99_v13 }
 0x10e   :  { %103 = vadd.xlane.f32.xlu1 %v101_v14 }
 0x10f   :  { %v96_v15 = vpop.xlane.xlu0 %95 }
 0x110   :  { %v98_v16 = vmul.f32 0.0078125, %v96_v15 }
 0x112   :  { %v100_v17 = vsub.f32 %v91_v10, %v98_v16 }
 0x114   :  { %v102_v18 = vmul.f32 %v100_v17, %v100_v17 }
 0x116   :  { %105 = vadd.xlane.f32.xlu1 %v102_v18 }
 0x181   :  { %v104_v19 = vpop.xlane.xlu1 %103 }
 0x182   :  { %v107_v20 = vmul.f32 0.0078125, %v104_v19 }
 0x184   :  { %v109_v21 = vadd.f32 1e-05, %v107_v20 }
 0x186   :  { %181 = vrsqrt.f32 %v109_v21  ;;  %vm117_vm2 = vweird.f32 %v109_v21 }
 0x189   :  { %v106_v22 = vpop.xlane.xlu1 %105 }
 0x18a   :  { %v108_v23 = vmul.f32 0.0078125, %v106_v22 }
 0x18c   :  { %v182_v24 = vpop.eup %181  ;;  %v110_v25 = vadd.f32 1e-05, %v108_v23 }
 0x18d   :  { %v112_v26 = vmul.f32 %v182_v24, %v109_v21  ;;  %vm118_vm1 = vweird.f32 %v182_v24 }
 0x18e   :  { %183 = vrsqrt.f32 %v110_v25  ;;  %vm119_vm3 = vmor %vm117_vm2, %vm118_vm1  ;;  %vm127_vm5 = vweird.f32 %v110_v25 }
 0x18f   :  { %v113_v27 = vmul.f32 %v182_v24, %v112_v26 }
 0x191   :  { %v114_v28 = vmul.f32 0.5, %v113_v27 }
 0x193   :  { %v115_v29 = vsub.f32 1.5, %v114_v28 }
 0x194   :  { %v184_v30 = vpop.eup %183 }
 0x195   :  { %v116_v31 = vmul.f32 %v182_v24, %v115_v29  ;;  %v122_v32 = vmul.f32 %v184_v30, %v110_v25  ;;  %vm128_vm4 = vweird.f32 %v184_v30 }
 0x196   :  { %vm129_vm6 = vmor %vm127_vm5, %vm128_vm4 }
 0x197   :  { %v120_v34 = vsel %vm119_vm3, %v182_v24, %v116_v31  ;;  %v123_v35 = vmul.f32 %v184_v30, %v122_v32 }
 0x198   :  { %v133_v36 = vmul.f32 %v120_v34, %v99_v13 }
 0x199   :  { %v124_v38 = vmul.f32 0.5, %v123_v35 }
 0x19a   :  { %v138_v39 = vmul.f32 %v179_v33, %v133_v36 }
 0x19b   :  { %v125_v40 = vsub.f32 1.5, %v124_v38 }
 0x19c   :  { %v143_v41 = vadd.f32 %v180_v37, %v138_v39 }
 0x19d   :  { %v126_v42 = vmul.f32 %v184_v30, %v125_v40 }
 0x19e   :  { %145 = vst [vmem:[#allocation7] sm:$0xff] %v143_v41 }
 0x19f   :  { %v130_v43 = vsel %vm129_vm6, %v184_v30, %v126_v42 }
 0x1a0   :  { %v134_v44 = vmul.f32 %v130_v43, %v100_v17 }
 0x1a2   :  { %v139_v45 = vmul.f32 %v179_v33, %v134_v44 }
 0x1a4   :  { %v144_v46 = vadd.f32 %v180_v37, %v139_v45 }
 0x1a6   :  { %146 = vst [vmem:[#allocation7 + $0x8] sm:$0xff] %v144_v46 }
 0x1a7   :  { %159 = dma.vmem_to_hbm [thread:$0]  %s152_s3, 256, %s154_s11, [#allocation4], %s264_s26, %s264_s26, %s265_s27  }
 0x1a8   :  { %261 = dma.done.wait [#allocation4], 256  }
 0x1a9   :  { %262 = vsyncadd [#allocation4], 4294967040 }
 0x1aa   :  { %164 = vsyncpa [#allocation3], 1 }
 0x1ab   :  { %165 = vsyncpa [#allocation6], 1 }
 0x1ac   :  { %166 = vsyncpa [#allocation4], 1 }

</bundles_post_ra>
